<compile_context>
chip_gen: v6e
topology: v6e:2x2x1
jax: 0.10.0
libtpu: 0.0.40
codegen_flags: <defaults>
</compile_context>

<pallas_src>
from functools import partial

import jax
import jax.numpy as jnp
from jax.experimental import pallas as pl
from jax.experimental.pallas import tpu as pltpu

BN_EPS = 1e-5
NEG_SLOPE = 0.1


def _round_up(x, m):
    return ((x + m - 1) // m) * m


def _vmem_budget_bytes():
    """Per-core VMEM budget (also used as vmem_limit_bytes) for this chip gen."""
    phys = 64 * 1024 * 1024            # conservative default: v7x per-TC VMEM
    try:
        phys = int(pltpu.get_tpu_info().vmem_capacity_bytes)
    except Exception:
        pass
    # ~48 MiB on v7x (64 MiB phys), ~96 MiB on v5e/v6e (128 MiB phys).
    return min(phys * 3 // 4, 100 * 1024 * 1024)


def _pick_tile_m(M, K, Cout, tm_req, budget, in_bytes):
    """Largest lane tile (multiple of 128) whose pipeline buffers fit `budget`."""
    tm = min(_round_up(tm_req, 128), _round_up(M, 128))
    tm = max(tm, 128)

    def need(t):
        pass1 = (3 * K * t * in_bytes        # (up to) triple-buffered patch stream
                 + 2 * Cout * t * 4          # double-buffered conv-out tile
                 + 2 * Cout * K * in_bytes   # resident conv weight
                 + 4 * Cout * 2 * 4)         # stats block + scratch
        pass2 = (2 * 2 * Cout * t * 4        # conv-in + out, double-buffered
                 + 4 * Cout * 2 * 4)
        return max(pass1, pass2)

    while tm > 128 and need(tm) > budget:
        tm -= 128
    return tm


def _patch_spec(block_shape, index_map, n_steps):
    """Patch-stream BlockSpec; 3-deep buffered when the per-split pipeline is
    long enough (hides residual DMA latency, mainly on v5e's lower HBM BW)."""
    if n_steps >= 3:
        try:
            return pl.BlockSpec(block_shape, index_map,
                                pipeline_mode=pl.Buffered(3))
        except Exception:
            pass  # API variant without pipeline_mode: fall back to default
    return pl.BlockSpec(block_shape, index_map)


def _conv_stats_kernel(p_ref, w_ref, conv_ref, stats_ref, acc_ref):
    """Pass 1: conv matmul + per-channel sum / sum-of-squares.

    Grid is (n_splits, tiles_per_split):
      axis 0 ("parallel")  : independent M ranges, one per TensorCore on v7x
      axis 1 ("arbitrary") : streamed M tiles within a split

    p_ref:     (K, TM)      im2col patch columns (output positions on lanes)
    w_ref:     (Cout, K)    flattened conv weight
    conv_ref:  (Cout, TM)   pre-BN conv tile (lane-dense)
    stats_ref: (1, Cout, 2) per-split [sum, sumsq], written once per split
    acc_ref:   (Cout, 2)    VMEM scratch accumulator
    """
    i = pl.program_id(1)

    @pl.when(i == 0)
    def _():
        acc_ref[...] = jnp.zeros_like(acc_ref)

    conv = jnp.dot(w_ref[...], p_ref[...], preferred_element_type=jnp.float32)
    conv_ref[...] = conv
    # Lane-axis (XLU) reductions, combined into a single (Cout, 2) store.
    acc_ref[...] += jnp.concatenate(
        [jnp.sum(conv, axis=-1, keepdims=True),
         jnp.sum(conv * conv, axis=-1, keepdims=True)], axis=-1)

    @pl.when(i == pl.num_programs(1) - 1)
    def _():
        stats_ref[0] = acc_ref[...]


def _bn_lrelu_kernel(conv_ref, stats_ref, gb_ref, o_ref, *, m_total, n_splits):
    """Pass 2: fold per-split stats, normalize, scale/shift, LeakyReLU(0.1).

    conv_ref:  (Cout, TM)          pre-BN conv tile (aliased to o_ref's buffer)
    stats_ref: (n_splits, Cout, 2) per-split [sum, sumsq] over the real M
    gb_ref:    (Cout, 2)           [gamma, beta]
    o_ref:     (Cout, TM)
    """
    stats = stats_ref[0]
    for s in range(1, n_splits):                       # tiny static fold
        stats = stats + stats_ref[s]

    inv_m = 1.0 / m_total
    mean = stats[:, 0:1] * inv_m                       # (Cout, 1)
    var = jnp.maximum(stats[:, 1:2] * inv_m - mean * mean, 0.0)  # clamp >= 0
    scale = gb_ref[:, 0:1] * jax.lax.rsqrt(var + BN_EPS)
    shift = gb_ref[:, 1:2] - mean * scale
    y = conv_ref[...] * scale + shift
    o_ref[...] = jnp.where(y > 0, y, NEG_SLOPE * y)


def conv_with_bn(x, weight, bias, gamma, beta, *, stride=1, padding=0,
                 tm=None, matmul_dtype=jnp.float32, channel_major_out=False):
    """x: (N, Cin, H, W) NCHW.  weight: (Cout, Cin, KH, KW).

    Returns NCHW by default; with channel_major_out=True returns the
    (Cout, N, OH, OW) slab the kernel produces natively (no transpose copy).

    `bias` is accepted for API parity with nn.Conv2d but is NOT computed: under
    TRAIN-mode BatchNorm (this module's forward) a per-channel pre-BN bias is
    exactly cancelled by the batch-mean subtraction.  Do not reuse this kernel
    for eval-mode BN / running statistics.
    """
    del bias  # exactly cancelled by the train-mode BN mean subtraction

    N, Cin, H, W = x.shape
    Cout, _, KH, KW = weight.shape
    OH = (H + 2 * padding - KH) // stride + 1
    OW = (W + 2 * padding - KW) // stride + 1
    M = N * OH * OW
    K = Cin * KH * KW

    in_bytes = jnp.dtype(matmul_dtype).itemsize
    budget = _vmem_budget_bytes()
    tm_req = 1024 if tm is None else tm
    assert tm_req % 128 == 0, "tile of output positions must be lane-aligned"
    tm_eff = _pick_tile_m(M, K, Cout, tm_req, budget, in_bytes)

    # ---- thin glue: im2col, emitted directly in transposed (K, M) layout ----
    x_pad = jnp.pad(x.astype(jnp.float32),
                    ((0, 0), (0, 0), (padding, padding), (padding, padding)))
    slices = []
    for kh in range(KH):
        for kw in range(KW):
            sl = x_pad[:, :, kh:kh + stride * OH:stride, kw:kw + stride * OW:stride]
            slices.append(sl)  # (N, Cin, OH, OW)
    # (KH*KW, N, Cin, OH, OW) -> (Cin, KH*KW, N, OH, OW) -> (K, M)
    pat = jnp.stack(slices, axis=0).transpose(2, 0, 1, 3, 4).reshape(K, M)
    pat = pat.astype(matmul_dtype)

    n_tiles = (M + tm_eff - 1) // tm_eff
    n_splits = 2 if n_tiles >= 2 else 1            # one split per TC on v7x
    tiles_per_split = (n_tiles + n_splits - 1) // n_splits
    total_tiles = n_splits * tiles_per_split
    m_pad = total_tiles * tm_eff
    if m_pad != M:
        # zero columns contribute 0 to both sum and sumsq -> stats stay exact
        pat = jnp.pad(pat, ((0, 0), (0, m_pad - M)))

    w_t = weight.reshape(Cout, K).astype(matmul_dtype)             # (Cout, K)
    gb = jnp.stack([gamma.astype(jnp.float32),
                    beta.astype(jnp.float32)], axis=1)             # (Cout, 2)

    cparams_p1 = pltpu.CompilerParams(
        dimension_semantics=("parallel", "arbitrary"),
        vmem_limit_bytes=budget)
    cparams_p2 = pltpu.CompilerParams(
        dimension_semantics=("parallel",),
        vmem_limit_bytes=budget)

    # ---- pass 1: conv matmul + per-channel sum / sumsq (per split) ----
    conv_t, stats = pl.pallas_call(
        _conv_stats_kernel,
        out_shape=(jax.ShapeDtypeStruct((Cout, m_pad), jnp.float32),
                   jax.ShapeDtypeStruct((n_splits, Cout, 2), jnp.float32)),
        grid=(n_splits, tiles_per_split),
        in_specs=[
            _patch_spec((K, tm_eff),
                        lambda s, i: (0, s * tiles_per_split + i),
                        tiles_per_split),
            pl.BlockSpec((Cout, K), lambda s, i: (0, 0)),
        ],
        out_specs=(
            pl.BlockSpec((Cout, tm_eff), lambda s, i: (0, s * tiles_per_split + i)),
            pl.BlockSpec((1, Cout, 2), lambda s, i: (s, 0, 0)),
        ),
        scratch_shapes=[pltpu.VMEM((Cout, 2), jnp.float32)],
        compiler_params=cparams_p1,
    )(pat, w_t)

    # ---- pass 2: fold stats, normalize + gamma/beta + LeakyReLU (in place) ----
    out_t = pl.pallas_call(
        partial(_bn_lrelu_kernel, m_total=float(M), n_splits=n_splits),
        out_shape=jax.ShapeDtypeStruct((Cout, m_pad), jnp.float32),
        grid=(total_tiles,),
        in_specs=[
            pl.BlockSpec((Cout, tm_eff), lambda i: (0, i)),
            pl.BlockSpec((n_splits, Cout, 2), lambda i: (0, 0, 0)),
            pl.BlockSpec((Cout, 2), lambda i: (0, 0)),
        ],
        out_specs=pl.BlockSpec((Cout, tm_eff), lambda i: (0, i)),
        input_output_aliases={0: 0},          # normalize the conv slab in place
        compiler_params=cparams_p2,
    )(conv_t, stats, gb)

    out_cm = out_t[:, :M].reshape(Cout, N, OH, OW)   # channel-major slab
    if channel_major_out:
        return out_cm
    # NCHW for parity with the PyTorch module (full-array transpose done by XLA
    # after the kernel; prefer channel_major_out=True in fused pipelines).
    return out_cm.transpose(1, 0, 2, 3)


def _reference(x, weight, bias, gamma, beta, *, stride, padding):
    """Pure-JAX reference matching the PyTorch forward (train-mode BN)."""
    conv = jax.lax.conv_general_dilated(
        x.astype(jnp.float32), weight.astype(jnp.float32),
        window_strides=(stride, stride),
        padding=[(padding, padding), (padding, padding)],
        dimension_numbers=("NCHW", "OIHW", "NCHW"),
    ) + bias.reshape(1, -1, 1, 1)
    mean = jnp.mean(conv, axis=(0, 2, 3), keepdims=True)
    var = jnp.mean((conv - mean) ** 2, axis=(0, 2, 3), keepdims=True)
    xhat = (conv - mean) * jax.lax.rsqrt(var + BN_EPS)
    y = xhat * gamma.reshape(1, -1, 1, 1) + beta.reshape(1, -1, 1, 1)
    return jnp.where(y > 0, y, NEG_SLOPE * y)


if __name__ == "__main__":
    # Small shapes consistent with the module: N=2, Cin=4, H=W=16, Cout=8, k=3, s=1, p=1
    N, Cin, H, W = 2, 4, 16, 16
    Cout, KH, KW = 8, 3, 3
    stride, padding = 1, 1

    key = jax.random.PRNGKey(0)
    kx, kwt, kb, kg, kbt = jax.random.split(key, 5)

    x = jax.random.normal(kx, (N, Cin, H, W), dtype=jnp.float32)
    # PyTorch Conv2d default init scale: uniform(-bound, bound), bound = 1/sqrt(Cin*KH*KW)
    bound = 1.0 / (Cin * KH * KW) ** 0.5
    weight = jax.random.uniform(kwt, (Cout, Cin, KH, KW), minval=-bound, maxval=bound,
                                dtype=jnp.float32)
    bias = jax.random.uniform(kb, (Cout,), minval=-bound, maxval=bound, dtype=jnp.float32)
    # BatchNorm2d default init is gamma=1, beta=0; use small deterministic perturbations
    gamma = 1.0 + 0.1 * jax.random.normal(kg, (Cout,), dtype=jnp.float32)
    beta = 0.1 * jax.random.normal(kbt, (Cout,), dtype=jnp.float32)

    ref = _reference(x, weight, bias, gamma, beta, stride=stride, padding=padding)
    ref = jax.block_until_ready(ref)

    # Run 1: default (auto) tile -> single big tile path, NCHW output.
    out = conv_with_bn(x, weight, bias, gamma, beta, stride=stride, padding=padding)
    out = jax.block_until_ready(out)
    assert out.shape == (N, Cout, H, W), out.shape
    assert jnp.allclose(out, ref, atol=1e-4, rtol=1e-4), float(jnp.max(jnp.abs(out - ref)))

    # Run 2: small tile -> exercises the multi-tile stream, the 2-way parallel
    # stats split (per-TC on v7x) and the transpose-free channel-major output.
    out2 = conv_with_bn(x, weight, bias, gamma, beta, stride=stride, padding=padding,
                        tm=128, channel_major_out=True)
    out2 = jax.block_until_ready(out2)
    ref_cm = jnp.transpose(ref, (1, 0, 2, 3))
    assert out2.shape == (Cout, N, H, W), out2.shape
    assert jnp.allclose(out2, ref_cm, atol=1e-4, rtol=1e-4), \
        float(jnp.max(jnp.abs(out2 - ref_cm)))

    print("KERNEL_OK")
</pallas_src>

<mosaic_0001>
module attributes {stable_mosaic.version = 11 : i64} {
  func.func @_conv_stats_kernel(%arg0: i32, %arg1: i32, %arg2: memref<36x512xf32, #tpu.memory_space<vmem>>, %arg3: memref<8x36xf32, #tpu.memory_space<vmem>>, %arg4: memref<8x512xf32, #tpu.memory_space<vmem>>, %arg5: memref<1x8x2xf32, #tpu.memory_space<vmem>>, %arg6: memref<8x2xf32, #tpu.memory_space<vmem>>) attributes {dimension_semantics = [#tpu.dimension_semantics<parallel>, #tpu.dimension_semantics<arbitrary>], iteration_bounds = array<i64: 1, 1>, scalar_prefetch = 0 : i64, scratch_operands = 1 : i64, tpu.core_type = #tpu.core_type<tc>, window_params = [{transform_indices = @transform_0, window_bounds = array<i64: 36, 512>}, {pipeline_mode = #tpu.pipeline_mode<synchronous>, transform_indices = @transform_1, window_bounds = array<i64: 8, 36>}, {transform_indices = @transform_2, window_bounds = array<i64: 8, 512>}, {transform_indices = @transform_3, window_bounds = array<i64: 1, 8, 2>}]} {
    %c0_i32 = arith.constant 0 : i32
    %0 = arith.cmpi eq, %arg1, %c0_i32 : i32
    %1 = arith.extui %0 : i1 to i32
    %c0_i32_0 = arith.constant 0 : i32
    %2 = arith.cmpi ne, %1, %c0_i32_0 : i32
    scf.if %2 {
      %cst_14 = arith.constant 0.000000e+00 : f32
      %19 = vector.broadcast %cst_14 : f32 to vector<8x2xf32>
      %c0_15 = arith.constant 0 : index
      %c0_16 = arith.constant 0 : index
      %20 = vector.load %arg6[%c0_15, %c0_16] : memref<8x2xf32, #tpu.memory_space<vmem>>, vector<8x2xf32>
      tpu.vector_store %arg6[%c0_15, %c0_16], %19 {strides = array<i32>} : memref<8x2xf32, #tpu.memory_space<vmem>>, vector<8x2xf32>,
    } else {
    }
    %c0 = arith.constant 0 : index
    %c0_1 = arith.constant 0 : index
    %3 = vector.load %arg3[%c0, %c0_1] : memref<8x36xf32, #tpu.memory_space<vmem>>, vector<8x36xf32>
    %c0_2 = arith.constant 0 : index
    %c0_3 = arith.constant 0 : index
    %4 = vector.load %arg2[%c0_2, %c0_3] : memref<36x512xf32, #tpu.memory_space<vmem>>, vector<36x512xf32>
    %cst = arith.constant dense<0.000000e+00> : vector<8x512xf32>
    %5 = tpu.matmul %3, %4, %cst {dimension_numbers = #tpu.dot_dimension_numbers<[1], [0], [0], [1], [0, 0, 1, 1], [], []>} : vector<8x36xf32>, vector<36x512xf32>, vector<8x512xf32> -> vector<8x512xf32>
    %c0_4 = arith.constant 0 : index
    %c0_5 = arith.constant 0 : index
    %6 = vector.load %arg4[%c0_4, %c0_5] : memref<8x512xf32, #tpu.memory_space<vmem>>, vector<8x512xf32>
    tpu.vector_store %arg4[%c0_4, %c0_5], %5 {strides = array<i32>} : memref<8x512xf32, #tpu.memory_space<vmem>>, vector<8x512xf32>,
    %c0_6 = arith.constant 0 : index
    %c0_7 = arith.constant 0 : index
    %7 = vector.load %arg6[%c0_6, %c0_7] : memref<8x2xf32, #tpu.memory_space<vmem>>, vector<8x2xf32>
    %cst_8 = arith.constant dense<0.000000e+00> : vector<8xf32>
    %8 = vector.multi_reduction <add>, %5, %cst_8 [1] : vector<8x512xf32> to vector<8xf32>
    %9 = vector.shape_cast %8 : vector<8xf32> to vector<8x1xf32>
    %10 = arith.mulf %5, %5 : vector<8x512xf32>
    %cst_9 = arith.constant dense<0.000000e+00> : vector<8xf32>
    %11 = vector.multi_reduction <add>, %10, %cst_9 [1] : vector<8x512xf32> to vector<8xf32>
    %12 = vector.shape_cast %11 : vector<8xf32> to vector<8x1xf32>
    %13 = tpu.concatenate %9, %12 in 1 : vector<8x1xf32>, vector<8x1xf32> -> vector<8x2xf32>
    %14 = arith.addf %7, %13 : vector<8x2xf32>
    %c0_10 = arith.constant 0 : index
    %c0_11 = arith.constant 0 : index
    %15 = vector.load %arg6[%c0_10, %c0_11] : memref<8x2xf32, #tpu.memory_space<vmem>>, vector<8x2xf32>
    tpu.vector_store %arg6[%c0_10, %c0_11], %14 {strides = array<i32>} : memref<8x2xf32, #tpu.memory_space<vmem>>, vector<8x2xf32>,
    %c0_i32_12 = arith.constant 0 : i32
    %16 = arith.cmpi eq, %arg1, %c0_i32_12 : i32
    %17 = arith.extui %16 : i1 to i32
    %c0_i32_13 = arith.constant 0 : i32
    %18 = arith.cmpi ne, %17, %c0_i32_13 : i32
    scf.if %18 {
      %c0_14 = arith.constant 0 : index
      %c0_15 = arith.constant 0 : index
      %19 = vector.load %arg6[%c0_14, %c0_15] : memref<8x2xf32, #tpu.memory_space<vmem>>, vector<8x2xf32>
      %c0_16 = arith.constant 0 : index
      %c0_17 = arith.constant 0 : index
      %c0_18 = arith.constant 0 : index
      %20 = vector.load %arg5[%c0_16, %c0_17, %c0_18] : memref<1x8x2xf32, #tpu.memory_space<vmem>>, vector<1x8x2xf32>
      %21 = vector.shape_cast %20 : vector<1x8x2xf32> to vector<8x2xf32>
      %22 = vector.shape_cast %19 : vector<8x2xf32> to vector<1x8x2xf32>
      tpu.vector_store %arg5[%c0_16, %c0_17, %c0_18], %22 {strides = array<i32>} : memref<1x8x2xf32, #tpu.memory_space<vmem>>, vector<1x8x2xf32>,
    } else {
    }
    return
  }
  func.func @transform_0(%arg0: i32, %arg1: i32) -> (i32, i32) {
    %c1_i32 = arith.constant 1 : i32
    %0 = arith.muli %arg0, %c1_i32 : i32
    %1 = arith.addi %0, %arg1 : i32
    %c0_i32 = arith.constant 0 : i32
    %c0_i32_0 = arith.constant 0 : i32
    return %c0_i32, %1 : i32, i32
  }
  func.func @transform_1(%arg0: i32, %arg1: i32) -> (i32, i32) {
    %c0_i32 = arith.constant 0 : i32
    %c0_i32_0 = arith.constant 0 : i32
    %c0_i32_1 = arith.constant 0 : i32
    return %c0_i32, %c0_i32_0 : i32, i32
  }
  func.func @transform_2(%arg0: i32, %arg1: i32) -> (i32, i32) {
    %c1_i32 = arith.constant 1 : i32
    %0 = arith.muli %arg0, %c1_i32 : i32
    %1 = arith.addi %0, %arg1 : i32
    %c0_i32 = arith.constant 0 : i32
    %c0_i32_0 = arith.constant 0 : i32
    return %c0_i32, %1 : i32, i32
  }
  func.func @transform_3(%arg0: i32, %arg1: i32) -> (i32, i32, i32) {
    %c0_i32 = arith.constant 0 : i32
    %c0_i32_0 = arith.constant 0 : i32
    %c0_i32_1 = arith.constant 0 : i32
    return %arg0, %c0_i32, %c0_i32_0 : i32, i32, i32
  }
}

</mosaic_0001>

<bundles_post_ra>
// kernel: tpu_custom_call.1
= control target key start
LH: loop header
LB: loop body
LE: loop exit
PB: predicated region body
PF: predicated region fallthrough
CT: control target
= control target key end

     0   :  { %9 = vsyncpa [#allocation4], 0  ;;  %s406_s0 = inlined_call_operand.hbm [shape: f32[36,512], index: 0, kind: input, shape index: {}]   ;;  %s407_s1 = inlined_call_operand.hbm [shape: f32[8,36], index: 1, kind: input, shape index: {}]   ;;  %s408_s2 = inlined_call_operand.hbm [shape: f32[8,512], index: 2, kind: output, shape index: {0}]   ;;  %s409_s3 = inlined_call_operand.vmem [shape: f32[1,8,2], index: 3, kind: output, shape index: {1}]  }
   0x1   :  { %10 = vsyncpa [#allocation7], 0 }
   0x2   :  { %11 = vsyncpa [#allocation5], 0  ;;  %s365_s12 = smov [#allocation3]  }
   0x3   :  { %s21_s13 = sshll.u32 %s365_s12, 4  ;;  %s22_s13 = int_to_ptr.vmem [resolvable:$true] %s21_s13 }
   0x4   :  { %s307_s14 = scalar_lea.vmem %s22_s13, 2560  ;;  %p312_p1 = scmp.lt.s32.totalorder %s22_s13, %s22_s13 }
   0x5   :  { %p308_p0 = scmp.ne.s32.totalorder %s22_s13, %s307_s14  ;;  %p313_p2 = scmp.lt.s32.totalorder %s307_s14, %s307_s14 }
   0x7   :  { %p314_p3 = por %p313_p2, %p312_p1 }
   0x9   :  { %p315_p4 = pnand %p314_p3, %p308_p0 }
   0xb   :  { %318 = shalt.err (!%p315_p4)
}
   0xc   :  { %s366_s15 = smov 512   ;;  %s367_s16 = smov 32  }
   0xd   :  { %27 = dma.hbm_to_vmem [thread:$0]  %s406_s0, 2560, %s22_s13, [#allocation4], %s366_s15, %s366_s15, %s367_s16  }
   0xe   :  { %s368_s19 = smov [#allocation6]  }
   0xf   :  { %s34_s20 = sshll.u32 %s368_s19, 4  ;;  %s35_s20 = int_to_ptr.vmem [resolvable:$true] %s34_s20 }
  0x10   :  { %s327_s21 = scalar_lea.vmem %s35_s20, 128  ;;  %p332_p6 = scmp.lt.s32.totalorder %s35_s20, %s35_s20 }
  0x11   :  { %p328_p5 = scmp.ne.s32.totalorder %s35_s20, %s327_s21  ;;  %p333_p7 = scmp.lt.s32.totalorder %s327_s21, %s327_s21 }
  0x13   :  { %p334_p8 = por %p333_p7, %p332_p6 }
  0x15   :  { %p335_p9 = pnand %p334_p8, %p328_p5 }
  0x17   :  { %338 = shalt.err (!%p335_p9)
}
  0x18   :  { %37 = dma.hbm_to_vmem [thread:$0]  %s407_s1, 128, %s35_s20, [#allocation7]  }
  0x19   :  { %359 = dma.done.wait [#allocation4], 2560  }
  0x1a   :  { %360 = vsyncadd [#allocation4], 4294964736 }
  0x1b   :  { %361 = dma.done.wait [#allocation7], 128  }
  0x1c   :  { %362 = vsyncadd [#allocation7], 4294967168  ;;  %vm52_vm0 = vcmask 15360   ;;  %v369_v0 = vmov 0.0   ;;  %vm79_vm1 = vcmask 1043456   ;;  %v68_v3 = vld [vmem:[#allocation3 + $0x68] sm:$0xff] }
  0x1d   :  { %53 = vst.msk [vmem:[#allocation2] sm:$0xff] %vm52_vm0, %v369_v0  ;;  %156 = vmatprep.mubr.f32.mxu0 %v369_v0  ;;  %227 = vmatprep.mubr.f32.mxu1 %v369_v0  ;;  %v72_v1 = vld [vmem:[#allocation3 + $0x88] sm:$0xf]  ;;  %v71_v2 = vld [vmem:[#allocation3 + $0x80] sm:$0xf]  ;;  %v70_v8 = vld [vmem:[#allocation3 + $0x78] sm:$0xff] }
  0x1e   :  { %287 = vmatprep.subr.msk.mxu0 %vm79_vm1, %v72_v1  ;;  %v74_v4 = vld [vmem:[#allocation3 + $0x98] sm:$0xf]  ;;  %v67_v5 = vld [vmem:[#allocation3 + $0x60] sm:$0xff]  ;;  %v73_v6 = vld [vmem:[#allocation3 + $0x90] sm:$0xf]  ;;  %vm75_vm2 = vcmask 293888  }
  0x1f   :  { %288 = vmatpush1.msk.msra.mxu0 %vm79_vm1, %v71_v2  ;;  %290 = vmatprep.subr.msk.mxu1 %vm79_vm1, %v74_v4  ;;  %v64_v7 = vld [vmem:[#allocation3 + $0x48] sm:$0xff]  ;;  %v63_v9 = vld [vmem:[#allocation3 + $0x40] sm:$0xff]  ;;  %v69_v10 = vld [vmem:[#allocation3 + $0x70] sm:$0xff]  ;;  %s370_s0 = smov [#allocation8]  }
  0x20   :  { %116 = vmatprep.subr.mxu0 %v68_v3  ;;  %291 = vmatpush1.msk.msra.mxu1 %vm79_vm1, %v73_v6  ;;  %v66_v11 = vld [vmem:[#allocation3 + $0x58] sm:$0xff]  ;;  %v60_v12 = vld [vmem:[#allocation3 + $0x28] sm:$0xff]  ;;  %v65_v13 = vld [vmem:[#allocation3 + $0x50] sm:$0xff]  ;;  %s273_s1 = sshll.u32 %s370_s0, 4  ;;  %s274_s1 = int_to_ptr.vmem [resolvable:$true] %s273_s1 }
  0x21   :  { %117 = vmatpush1.msra.mxu0 %v67_v5  ;;  %187 = vmatprep.subr.mxu1 %v70_v8  ;;  %v59_v14 = vld [vmem:[#allocation3 + $0x20] sm:$0xff]  ;;  %v62_v15 = vld [vmem:[#allocation3 + $0x38] sm:$0xff]  ;;  %v56_v16 = vld [vmem:[#allocation3 + $0x8] sm:$0xff]  ;;  %s339_s24 = scalar_lea.vmem %s274_s1, 512  ;;  %p344_p11 = scmp.lt.s32.totalorder %s274_s1, %s274_s1 }
  0x22   :  { %118 = vmatprep.subr.mxu0 %v64_v7  ;;  %188 = vmatpush1.msra.mxu1 %v69_v10  ;;  %v61_v17 = vld [vmem:[#allocation3 + $0x30] sm:$0xff]  ;;  %v55_v18 = vld [vmem:[#allocation3] sm:$0xff]  ;;  %v58_v19 = vld [vmem:[#allocation3 + $0x18] sm:$0xff]  ;;  %p340_p10 = scmp.ne.s32.totalorder %s274_s1, %s339_s24  ;;  %p345_p12 = scmp.lt.s32.totalorder %s339_s24, %s339_s24 }
  0x23   :  { %119 = vmatpush1.msra.mxu0 %v63_v9  ;;  %189 = vmatprep.subr.mxu1 %v66_v11  ;;  %v54_v20 = vld [vmem:[#allocation6] sm:$0xff]  ;;  %v57_v21 = vld [vmem:[#allocation3 + $0x10] sm:$0xff] }
  0x24   :  { %120 = vmatprep.subr.mxu0 %v60_v12  ;;  %190 = vmatpush1.msra.mxu1 %v65_v13  ;;  %p346_p13 = por %p345_p12, %p344_p11 }
  0x25   :  { %121 = vmatpush1.msra.mxu0 %v59_v14  ;;  %191 = vmatprep.subr.mxu1 %v62_v15 }
  0x26   :  { %122 = vmatprep.subr.mxu0 %v56_v16  ;;  %192 = vmatpush1.msra.mxu1 %v61_v17  ;;  %p347_p0 = pnand %p346_p13, %p340_p10 }
  0x27   :  { %123 = vmatpush1.msra.mxu0 %v55_v18  ;;  %193 = vmatprep.subr.mxu1 %v58_v19 }
  0x28   :  { %289 = vmatmul.mubr.msk.f32.vlgmr.msra.gmra.mxu0 %vm75_vm2, %v54_v20  ;;  %194 = vmatpush1.msra.mxu1 %v57_v21 }
  0x29   :  { %292 = vmatmul.mubr.msk.f32.vlgmr.msra.gmra.mxu1 %vm75_vm2, %v54_v20 }
  0xe8   :  { %v158_v22 = vpop.f32.mrf.mxu0 }
  0xe9   :  { %234 = vst [vmem:[#allocation8] sm:$0xff] %v158_v22  ;;  %v229_v23 = vpop.f32.mrf.mxu1  ;;  %v244_v25 = vmul.f32 %v158_v22, %v158_v22 }
  0xea   :  { %v160_v24 = vpop.f32.mrf.mxu0  ;;  %236 = vst [vmem:[#allocation8 + $0x10] sm:$0xff] %v229_v23  ;;  %v246_v28 = vmul.f32 %v229_v23, %v229_v23 }
  0xeb   :  { %235 = vst [vmem:[#allocation8 + $0x8] sm:$0xff] %v160_v24  ;;  %v239_v26 = vadd.f32 %v160_v24, %v158_v22  ;;  %v245_v27 = vmul.f32 %v160_v24, %v160_v24  ;;  %v231_v29 = vpop.f32.mrf.mxu1 }
  0xec   :  { %237 = vst [vmem:[#allocation8 + $0x18] sm:$0xff] %v231_v29  ;;  %v247_v34 = vmul.f32 %v231_v29, %v231_v29 }
  0xed   :  { %v248_v30 = vadd.f32 %v245_v27, %v244_v25  ;;  %v240_v31 = vadd.f32 %v239_v26, %v229_v23 }
  0xef   :  { %v241_v32 = vadd.f32 %v240_v31, %v231_v29  ;;  %v249_v33 = vadd.f32 %v248_v30, %v246_v28 }
  0xf1   :  { %242 = vadd.xlane.f32.xlu0 %v241_v32  ;;  %v250_v35 = vadd.f32 %v249_v33, %v247_v34 }
  0xf5   :  { %251 = vadd.xlane.f32.xlu0 %v250_v35 }
  0xf6   :  { %350 = shalt.err (!%p347_p0)
}
  0xf7   :  { %276 = dma.vmem_to_hbm [thread:$0]  %s274_s1, 512, %s408_s2, [#allocation5]   ;;  %vm253_vm3 = vcmask 7168   ;;  %v238_v37 = vld [vmem:[#allocation2] sm:$0xff] }
 0x17a   :  { %v243_v36 = vpop.xlane.xlu0 %242 }
 0x17e   :  { %v252_v38 = vpop.xlane.xlu0 %251 }
 0x17f   :  { %v254_v39 = vsel %vm253_vm3, %v243_v36, %v252_v38 }
 0x180   :  { %v255_v40 = vadd.f32 %v254_v39, %v238_v37 }
 0x182   :  { %257 = vst.msk [vmem:[#allocation2] sm:$0xff] %vm52_vm0, %v255_v40 }
 0x189   :  { %v261_v41 = vld [vmem:[#allocation2] sm:$0xff] }
 0x18a   :  { %262 = vst.msk [vmem:[%s409_s3] sm:$0xff] %vm52_vm0, %v261_v41 }
 0x18b   :  { %363 = dma.done.wait [#allocation5], 512  }
 0x18c   :  { %364 = vsyncadd [#allocation5], 4294966784 }
 0x18d   :  { %284 = vsyncpa [#allocation4], 1 }
 0x18e   :  { %285 = vsyncpa [#allocation7], 1 }
 0x18f   :  { %286 = vsyncpa [#allocation5], 1 }

</bundles_post_ra>
